<compile_context>
chip_gen: v7x
topology: tpu7x:2x2x1
jax: 0.10.0
libtpu: 0.0.40
codegen_flags: <defaults>
</compile_context>

<pallas_src>
import functools

import jax
import jax.numpy as jnp
from jax.experimental import pallas as pl
from jax.experimental.pallas import tpu as pltpu

LANES = 128
ACC_ROWS = 8                   # accumulator = one (8, 128) f32 vreg
TARGET_BLOCK_BYTES = 1 << 20   # ~1 MiB per input block per grid step


def _sublane(dtype):
    return {4: 8, 2: 16, 1: 32}.get(jnp.dtype(dtype).itemsize, 8)


def _pick_tile_rows(rows, dtype):
    """Largest sublane-aligned tile that (ideally) divides `rows`."""
    max_rows = max(TARGET_BLOCK_BYTES // (LANES * jnp.dtype(dtype).itemsize),
                   ACC_ROWS)
    if rows <= max_rows:
        return rows                        # full-extent block is always legal
    sub = _sublane(dtype)
    t = (max_rows // sub) * sub
    while t >= sub:
        if rows % t == 0:
            return t                       # divides evenly -> mask not needed
        t -= sub
    return (max_rows // sub) * sub         # ragged; in-kernel mask handles it


def _mse_kernel(x_ref, y_ref, o_ref, *, rows, tile_rows, blocks_per_core,
                needs_mask):
    # x_ref, y_ref : (tile_rows, LANES) VMEM input tiles (native dtype)
    # o_ref        : (ACC_ROWS, LANES) f32 output block, resident across k
    p = pl.program_id(0)   # partial-sum / TensorCore index
    k = pl.program_id(1)   # block index within this core's row range

    @pl.when(k == 0)
    def _():
        o_ref[...] = jnp.zeros_like(o_ref)

    # Widen after the DMA so HBM traffic stays at the input dtype width.
    d = x_ref[...].astype(jnp.float32) - y_ref[...].astype(jnp.float32)

    if needs_mask:
        # Zero rows past the real row count (ragged last block / overflow
        # blocks of the dual-core split).  Applied to d BEFORE squaring so
        # any garbage in the Pallas-padded region (incl. NaN) is dropped.
        row_ids = jax.lax.broadcasted_iota(jnp.int32, (tile_rows, LANES), 0)
        base = (p * blocks_per_core + k) * tile_rows
        d = jnp.where(base + row_ids < rows, d, jnp.float32(0.0))

    sq = d * d
    rem = tile_rows % ACC_ROWS
    if rem:  # only for tiny full-extent blocks (rows < 8)
        sq = jnp.concatenate(
            [sq, jnp.zeros((ACC_ROWS - rem, LANES), jnp.float32)], axis=0)
    groups = sq.shape[0] // ACC_ROWS
    # Fold the whole tile into one (8, 128) vreg: pure VALU vreg adds.
    o_ref[...] += sq.reshape(groups, ACC_ROWS, LANES).sum(axis=0)


def mse_loss_pallas(generated, target):
    """Mean squared error over all elements (scalar), via a Pallas TPU kernel."""
    assert generated.shape == target.shape, "MSELoss requires matching shapes"
    n_elems = generated.size

    x = generated.reshape(-1)
    y = target.reshape(-1)

    n_main = (n_elems // LANES) * LANES
    n_tail = n_elems - n_main

    total = jnp.float32(0.0)

    if n_main:
        rows = n_main // LANES
        xm = x[:n_main].reshape(rows, LANES)
        ym = y[:n_main].reshape(rows, LANES)

        tile_rows = _pick_tile_rows(rows, xm.dtype)
        num_blocks = pl.cdiv(rows, tile_rows)
        num_cores = 2 if num_blocks >= 2 else 1      # megacore split (v7x)
        blocks_per_core = pl.cdiv(num_blocks, num_cores)
        needs_mask = (num_cores * blocks_per_core * tile_rows) != rows
        last_block = num_blocks - 1

        if needs_mask:
            # Clamp overflow block indices so the DMA window stays in bounds;
            # the in-kernel row mask zeroes their contribution.
            def in_map(p, k):
                return (jnp.minimum(p * blocks_per_core + k, last_block), 0)
        else:
            def in_map(p, k):
                return (p * blocks_per_core + k, 0)

        kernel = functools.partial(
            _mse_kernel, rows=rows, tile_rows=tile_rows,
            blocks_per_core=blocks_per_core, needs_mask=needs_mask)

        itemsize = jnp.dtype(xm.dtype).itemsize
        cost = pl.CostEstimate(
            flops=3 * n_main,             # sub, mul, add per element
            transcendentals=0,
            bytes_accessed=2 * n_main * itemsize
            + num_cores * ACC_ROWS * LANES * 4)

        partials = pl.pallas_call(
            kernel,
            out_shape=jax.ShapeDtypeStruct((num_cores * ACC_ROWS, LANES),
                                           jnp.float32),
            grid_spec=pltpu.PrefetchScalarGridSpec(
                num_scalar_prefetch=0,
                grid=(num_cores, blocks_per_core),
                in_specs=[
                    pl.BlockSpec((tile_rows, LANES), in_map),
                    pl.BlockSpec((tile_rows, LANES), in_map),
                ],
                out_specs=pl.BlockSpec((ACC_ROWS, LANES), lambda p, k: (p, 0)),
            ),
            compiler_params=pltpu.CompilerParams(
                dimension_semantics=("parallel", "arbitrary")),
            cost_estimate=cost,
        )(xm, ym)
        total = total + jnp.sum(partials)

    if n_tail:
        # <128-element tail: trivial XLA reduction (avoids padded HBM copies).
        dt = x[n_main:].astype(jnp.float32) - y[n_main:].astype(jnp.float32)
        total = total + jnp.sum(dt * dt)

    return total / jnp.float32(n_elems)


class ContentLossVGG:
    """JAX/Pallas port of the PyTorch ContentLossVGG loss reduction.

    TODO(synk): the frozen pretrained VGG19 feature-extraction trunk is not
    implemented (no pretrained weights available in-script); callers pass the
    tensors to compare and this computes nn.MSELoss() over them.
    """

    def __init__(self, feature_map_block_idx=4):
        # Only affects the (omitted) VGG feature trunk.
        del feature_map_block_idx

    def __call__(self, generated_fake_images, target_images):
        return mse_loss_pallas(generated_fake_images, target_images)


if __name__ == "__main__":
    key = jax.random.PRNGKey(0)
    k1, k2, k3, k4, k5, k6, k7, k8 = jax.random.split(key, 8)

    loss_fn = ContentLossVGG()

    def ref_mse(a, b):
        return jnp.mean((a.astype(jnp.float32) - b.astype(jnp.float32)) ** 2)

    # 1) Primary check: small NCHW feature-map-like inputs, lane-aligned size.
    gen = jax.random.normal(k1, (2, 4, 16, 16), dtype=jnp.float32)
    tgt = jax.random.normal(k2, (2, 4, 16, 16), dtype=jnp.float32)
    loss = jax.block_until_ready(loss_fn(gen, tgt))
    assert jnp.allclose(loss, ref_mse(gen, tgt), rtol=1e-5, atol=1e-6)

    # 2) Ragged size (exercises the <128-element lane-tail path).
    gen2 = jax.random.normal(k3, (2, 3, 5, 7), dtype=jnp.float32)
    tgt2 = jax.random.normal(k4, (2, 3, 5, 7), dtype=jnp.float32)
    loss2 = jax.block_until_ready(loss_fn(gen2, tgt2))
    assert jnp.allclose(loss2, ref_mse(gen2, tgt2), rtol=1e-5, atol=1e-6)

    # 3) Multi-block + dual-core split, divisor tiling (no mask), f32.
    gen3 = jax.random.normal(k5, (2, 160, 32, 32), dtype=jnp.float32)
    tgt3 = jax.random.normal(k6, (2, 160, 32, 32), dtype=jnp.float32)
    loss3 = jax.block_until_ready(loss_fn(gen3, tgt3))
    assert jnp.allclose(loss3, ref_mse(gen3, tgt3), rtol=1e-4, atol=1e-6)

    # 4) bf16 inputs with an awkward row count (exercises the in-kernel row
    #    mask and the clamped overflow block of the dual-core split).
    gen4 = jax.random.normal(k7, (10200, 128), dtype=jnp.bfloat16)
    tgt4 = jax.random.normal(k8, (10200, 128), dtype=jnp.bfloat16)
    loss4 = jax.block_until_ready(loss_fn(gen4, tgt4))
    assert jnp.allclose(loss4, ref_mse(gen4, tgt4), rtol=1e-4, atol=1e-6)

    print("KERNEL_OK")
</pallas_src>

<mosaic_0001>
module attributes {stable_mosaic.version = 11 : i64} {
  func.func @_mse_kernel(%arg0: i32, %arg1: i32, %arg2: memref<16x128xf32, #tpu.memory_space<vmem>>, %arg3: memref<16x128xf32, #tpu.memory_space<vmem>>, %arg4: memref<8x128xf32, #tpu.memory_space<vmem>>) attributes {dimension_semantics = [#tpu.dimension_semantics<parallel>, #tpu.dimension_semantics<arbitrary>], iteration_bounds = array<i64: 1, 1>, scalar_prefetch = 0 : i64, scratch_operands = 0 : i64, tpu.core_type = #tpu.core_type<tc>, window_params = [{transform_indices = @transform_0, window_bounds = array<i64: 16, 128>}, {transform_indices = @transform_1, window_bounds = array<i64: 16, 128>}, {transform_indices = @transform_2, window_bounds = array<i64: 8, 128>}]} {
    %c0_i32 = arith.constant 0 : i32
    %0 = arith.cmpi eq, %arg1, %c0_i32 : i32
    %1 = arith.extui %0 : i1 to i32
    %c0_i32_0 = arith.constant 0 : i32
    %2 = arith.cmpi ne, %1, %c0_i32_0 : i32
    scf.if %2 {
      %cst_8 = arith.constant 0.000000e+00 : f32
      %12 = vector.broadcast %cst_8 : f32 to vector<8x128xf32>
      %c0_9 = arith.constant 0 : index
      %c0_10 = arith.constant 0 : index
      %13 = vector.load %arg4[%c0_9, %c0_10] : memref<8x128xf32, #tpu.memory_space<vmem>>, vector<8x128xf32>
      tpu.vector_store %arg4[%c0_9, %c0_10], %12 {strides = array<i32>} : memref<8x128xf32, #tpu.memory_space<vmem>>, vector<8x128xf32>,
    } else {
    }
    %c0 = arith.constant 0 : index
    %c0_1 = arith.constant 0 : index
    %3 = vector.load %arg2[%c0, %c0_1] : memref<16x128xf32, #tpu.memory_space<vmem>>, vector<16x128xf32>
    %c0_2 = arith.constant 0 : index
    %c0_3 = arith.constant 0 : index
    %4 = vector.load %arg3[%c0_2, %c0_3] : memref<16x128xf32, #tpu.memory_space<vmem>>, vector<16x128xf32>
    %5 = arith.subf %3, %4 : vector<16x128xf32>
    %6 = arith.mulf %5, %5 : vector<16x128xf32>
    %c0_4 = arith.constant 0 : index
    %c0_5 = arith.constant 0 : index
    %7 = vector.load %arg4[%c0_4, %c0_5] : memref<8x128xf32, #tpu.memory_space<vmem>>, vector<8x128xf32>
    %8 = vector.shape_cast %6 : vector<16x128xf32> to vector<2x8x128xf32>
    %cst = arith.constant dense<0.000000e+00> : vector<8x128xf32>
    %9 = vector.multi_reduction <add>, %8, %cst [0] : vector<2x8x128xf32> to vector<8x128xf32>
    %10 = arith.addf %7, %9 : vector<8x128xf32>
    %c0_6 = arith.constant 0 : index
    %c0_7 = arith.constant 0 : index
    %11 = vector.load %arg4[%c0_6, %c0_7] : memref<8x128xf32, #tpu.memory_space<vmem>>, vector<8x128xf32>
    tpu.vector_store %arg4[%c0_6, %c0_7], %10 {strides = array<i32>} : memref<8x128xf32, #tpu.memory_space<vmem>>, vector<8x128xf32>,
    return
  }
  func.func @transform_0(%arg0: i32, %arg1: i32) -> (i32, i32) {
    %c1_i32 = arith.constant 1 : i32
    %0 = arith.muli %arg0, %c1_i32 : i32
    %1 = arith.addi %0, %arg1 : i32
    %c0_i32 = arith.constant 0 : i32
    %c0_i32_0 = arith.constant 0 : i32
    return %1, %c0_i32 : i32, i32
  }
  func.func @transform_1(%arg0: i32, %arg1: i32) -> (i32, i32) {
    %c1_i32 = arith.constant 1 : i32
    %0 = arith.muli %arg0, %c1_i32 : i32
    %1 = arith.addi %0, %arg1 : i32
    %c0_i32 = arith.constant 0 : i32
    %c0_i32_0 = arith.constant 0 : i32
    return %1, %c0_i32 : i32, i32
  }
  func.func @transform_2(%arg0: i32, %arg1: i32) -> (i32, i32) {
    %c0_i32 = arith.constant 0 : i32
    %c0_i32_0 = arith.constant 0 : i32
    return %arg0, %c0_i32 : i32, i32
  }
}

</mosaic_0001>

<bundles_post_ra>
// kernel: tpu_custom_call.1
= control target key start
LH: loop header
LB: loop body
LE: loop exit
PB: predicated region body
PF: predicated region fallthrough
CT: control target
= control target key end

     0   :  { %7 = vsyncpa [#allocation3], 0  ;;  %s219_s0 = inlined_call_operand.hbm [shape: f32[16,128], index: 0, kind: input, shape index: {}]   ;;  %s220_s1 = inlined_call_operand.hbm [shape: f32[16,128], index: 1, kind: input, shape index: {}]   ;;  %s221_s2 = inlined_call_operand.hbm [shape: f32[8,128], index: 2, kind: output, shape index: {}]  }
   0x1   :  { %8 = vsyncpa [#allocation6], 0 }
   0x2   :  { %9 = vsyncpa [#allocation4], 0  ;;  %s163_s9 = smov [#allocation2]   ;;  %s91_s13 = scalar_lea.hbm %s219_s0, 256 }
   0x3   :  { %s19_s10 = sshll.u32 %s163_s9, 4  ;;  %p92_p0 = scmp.ne.s32.totalorder %s219_s0, %s91_s13  ;;  %s20_s10 = int_to_ptr.vmem [resolvable:$true] %s19_s10 }
   0x4   :  { %p95_p1 = scmp.lt.u32.totalorder %s91_s13, %s219_s0 }
   0x6   :  { %p97_p2 = pnand %p95_p1, %p92_p0 }
   0x8   :  { %100 = shalt.err (!%p97_p2)
}
   0x9   :  { %s101_s18 = scalar_lea.vmem %s20_s10, 256  ;;  %p106_p4 = scmp.lt.s32.totalorder %s20_s10, %s20_s10 }
   0xa   :  { %p102_p3 = scmp.ne.s32.totalorder %s20_s10, %s101_s18  ;;  %p107_p5 = scmp.lt.s32.totalorder %s101_s18, %s101_s18 }
   0xc   :  { %p108_p6 = por %p107_p5, %p106_p4 }
   0xe   :  { %p109_p7 = pnand %p108_p6, %p102_p3 }
  0x10   :  { %112 = shalt.err (!%p109_p7)
}
  0x11   :  { %s164_s19 = smov 128   ;;  %s165_s20 = smov 8  }
  0x12   :  { %25 = dma.hbm_to_vmem [thread:$0]  %s219_s0, 256, %s20_s10, [#allocation3], %s164_s19, %s164_s19, %s165_s20  }
  0x13   :  { %s166_s23 = smov [#allocation5]   ;;  %s113_s27 = scalar_lea.hbm %s220_s1, 256 }
  0x14   :  { %s35_s24 = sshll.u32 %s166_s23, 4  ;;  %p114_p8 = scmp.ne.s32.totalorder %s220_s1, %s113_s27  ;;  %s36_s24 = int_to_ptr.vmem [resolvable:$true] %s35_s24 }
  0x15   :  { %p117_p9 = scmp.lt.u32.totalorder %s113_s27, %s220_s1 }
  0x17   :  { %p119_p10 = pnand %p117_p9, %p114_p8 }
  0x19   :  { %122 = shalt.err (!%p119_p10)
}
  0x1a   :  { %s123_s4 = scalar_lea.vmem %s36_s24, 256  ;;  %p128_p12 = scmp.lt.s32.totalorder %s36_s24, %s36_s24 }
  0x1b   :  { %p124_p11 = scmp.ne.s32.totalorder %s36_s24, %s123_s4  ;;  %p129_p13 = scmp.lt.s32.totalorder %s123_s4, %s123_s4 }
  0x1d   :  { %p130_p0 = por %p129_p13, %p128_p12 }
  0x1f   :  { %p131_p1 = pnand %p130_p0, %p124_p11 }
  0x21   :  { %134 = shalt.err (!%p131_p1)
}
  0x22   :  { %41 = dma.hbm_to_vmem [thread:$0]  %s220_s1, 256, %s36_s24, [#allocation6], %s164_s19, %s164_s19, %s165_s20  }
  0x23   :  { %157 = dma.done.wait [#allocation3], 256  }
  0x24   :  { %158 = vsyncadd [#allocation3], 4294967040 }
  0x25   :  { %159 = dma.done.wait [#allocation6], 256  }
  0x26   :  { %160 = vsyncadd [#allocation6], 4294967040  ;;  %v57_v0 = vld [vmem:[#allocation2] sm:$0xff]  ;;  %v58_v1 = vld [vmem:[#allocation2 + $0x8] sm:$0xff]  ;;  %s167_s6 = smov [#allocation7]  }
  0x27   :  { %v59_v2 = vld [vmem:[#allocation5] sm:$0xff]  ;;  %v60_v3 = vld [vmem:[#allocation5 + $0x8] sm:$0xff]  ;;  %s75_s7 = sshll.u32 %s167_s6, 4  ;;  %s76_s7 = int_to_ptr.vmem [resolvable:$true] %s75_s7 }
  0x28   :  { %v61_v4 = vsub.f32 %v57_v0, %v59_v2  ;;  %v62_v5 = vsub.f32 %v58_v1, %v60_v3  ;;  %s135_s8 = scalar_lea.vmem %s76_s7, 128  ;;  %p140_p3 = scmp.lt.s32.totalorder %s76_s7, %s76_s7 }
  0x29   :  { %p136_p2 = scmp.ne.s32.totalorder %s76_s7, %s135_s8  ;;  %p141_p4 = scmp.lt.s32.totalorder %s135_s8, %s135_s8 }
  0x2a   :  { %v63_v6 = vmul.f32 %v61_v4, %v61_v4  ;;  %v64_v7 = vmul.f32 %v62_v5, %v62_v5 }
  0x2b   :  { %p142_p5 = por %p141_p4, %p140_p3 }
  0x2c   :  { %v66_v8 = vadd.f32 %v64_v7, %v63_v6 }
  0x2d   :  { %p143_p6 = pnand %p142_p5, %p136_p2 }
  0x2e   :  { %68 = vst [vmem:[#allocation7] sm:$0xff] %v66_v8 }
  0x2f   :  { %146 = shalt.err (!%p143_p6)
}
  0x30   :  { %s147_s10 = scalar_lea.hbm %s221_s2, 128 }
  0x31   :  { %p148_p7 = scmp.ne.s32.totalorder %s221_s2, %s147_s10  ;;  %p151_p8 = scmp.lt.u32.totalorder %s147_s10, %s221_s2 }
  0x33   :  { %p153_p9 = pnand %p151_p8, %p148_p7 }
  0x35   :  { %156 = shalt.err (!%p153_p9)
}
  0x36   :  { %78 = dma.vmem_to_hbm [thread:$0]  %s76_s7, 128, %s221_s2, [#allocation4]  }
  0x37   :  { %161 = dma.done.wait [#allocation4], 128  }
  0x38   :  { %162 = vsyncadd [#allocation4], 4294967168 }
  0x39   :  { %82 = vsyncpa [#allocation3], 1 }
  0x3a   :  { %83 = vsyncpa [#allocation6], 1 }
  0x3b   :  { %84 = vsyncpa [#allocation4], 1 }

</bundles_post_ra>
